<compile_context>
chip_gen: v7x
topology: tpu7x:2x2x1
jax: 0.10.0
libtpu: 0.0.40
codegen_flags: <defaults>
</compile_context>

<pallas_src>
import functools
import math

import jax
import jax.numpy as jnp
from jax.experimental import pallas as pl
from jax.experimental.pallas import tpu as pltpu


# ----------------------------------------------------------------------------
# Fused kernel: upsample matmul + num_layers AoA gates on one row tile.
# refs = (x, ctx, up_w, up_b, [w_h_merged, w_c_merged, b_merged] * L, out)
# ----------------------------------------------------------------------------
def _fused_kernel(num_layers, *refs):
    x_ref, ctx_ref, up_w_ref, up_b_ref = refs[:4]
    layer_refs = refs[4:4 + 3 * num_layers]
    o_ref = refs[4 + 3 * num_layers]
    ncols = o_ref.shape[-1]

    x = x_ref[...]          # bf16 (tm, kx)
    ctx = ctx_ref[...]      # bf16 (tm, ncols)

    # 2x2 / stride-2 transposed conv == plain matmul (kernel == stride, no
    # output overlap); block-diagonal packing keeps pixels independent.
    # bf16 MXU operands, f32 accumulation, f32 bias.
    h = jnp.dot(x, up_w_ref[...], preferred_element_type=jnp.float32) + up_b_ref[...]

    for l in range(num_layers):                       # small static layer count
        w_h, w_c, b = layer_refs[3 * l:3 * l + 3]
        # info|gate weights are merged along N -> one wide matmul for the
        # h-half and one for the ctx-half of the (never materialized) concat.
        y = (jnp.dot(h.astype(w_h.dtype), w_h[...],
                     preferred_element_type=jnp.float32)
             + jnp.dot(ctx, w_c[...], preferred_element_type=jnp.float32)
             + b[...])
        info = y[:, :ncols]
        gate = y[:, ncols:]
        # sigmoid = 1 / (1 + exp(-gate)): exp and approx reciprocal both run on
        # the EUP slot, keeping the VALU free for the bias adds / multiply.
        h = info * pl.reciprocal(1.0 + jnp.exp(-gate), approx=True)

    o_ref[...] = h.astype(o_ref.dtype)


# ----------------------------------------------------------------------------
# Helpers
# ----------------------------------------------------------------------------
def _block_diag(w, p):
    """[a, b] -> block-diagonal [p*a, p*b] with p copies of w on the diagonal."""
    a, b = w.shape
    eye = jnp.eye(p, dtype=w.dtype)
    return (eye[:, None, :, None] * w[None, :, None, :]).reshape(p * a, p * b)


def _nbytes(a):
    # works on tracers too (no .nbytes on abstract values)
    return int(a.size) * jnp.dtype(a.dtype).itemsize


def _chip_config():
    """(lane_target, vmem_limit_bytes, min_grid_steps) by TPU generation."""
    lane_target, vmem_limit, min_steps = 128, 32 * 1024 * 1024, 1   # safe default
    try:
        kind = jax.devices()[0].device_kind.lower()
    except Exception:
        return lane_target, vmem_limit, min_steps
    if any(t in kind for t in ("v2", "v3", "v4", "v5")):
        # 128-wide MXU generations; 128 MiB VMEM -> allow a 64 MiB scoped limit.
        return 128, 64 * 1024 * 1024, 1
    if "v6" in kind:
        # 2x256x256 MXU, single TensorCore, 128 MiB VMEM.
        return 256, 64 * 1024 * 1024, 1
    # v7x and newer: 2 TensorCores/chip, 64 MiB VMEM -> smaller scoped limit and
    # >=4 grid steps so both cores get pipelined work.
    return 256, 32 * 1024 * 1024, 4


def _pick_tm(rows, kx, ncols, out_itemsize, weight_bytes, vmem_limit, min_steps,
             cap=4096):
    """Row tile from the VMEM budget: 2 buffers for each of the x (bf16),
    ctx (bf16) and out tiles, weights counted double-buffered, 25% headroom."""
    per_row = 2 * (2 * kx + 2 * ncols + out_itemsize * ncols)
    budget = int(0.75 * vmem_limit) - 2 * weight_bytes
    tm = max(budget // per_row, 16) if per_row > 0 else rows
    tm = min(tm, cap, rows)
    if min_steps > 1:
        tm = min(tm, -(-rows // min_steps))
    tm = max(16, (tm // 16) * 16)        # multiple of 16 (bf16 sublane packing)
    return tm


# ----------------------------------------------------------------------------
# Parameter init (deterministic, PyTorch-style fan-in uniform).
# ----------------------------------------------------------------------------
def init_up_triangle1_params(key, in_features, out_features, num_layers=1):
    params = {}
    k_w, k_b, key = jax.random.split(key, 3)

    # ConvTranspose2d(in_features, out_features, kernel_size=2, stride=2)
    fan_in = in_features * 2 * 2
    bound = 1.0 / math.sqrt(fan_in)
    params["up_w"] = jax.random.uniform(
        k_w, (in_features, out_features, 2, 2), jnp.float32, -bound, bound)
    params["up_b"] = jax.random.uniform(
        k_b, (out_features,), jnp.float32, -bound, bound)

    # AoA layers: 1x1 convs on concat([h, ctx]) -> out_features
    layers = []
    cin = 2 * out_features
    bound2 = 1.0 / math.sqrt(cin)
    for _ in range(num_layers):
        ki, kbi, kg, kbg, key = jax.random.split(key, 5)
        layers.append(dict(
            wi=jax.random.uniform(ki, (cin, out_features), jnp.float32, -bound2, bound2),
            bi=jax.random.uniform(kbi, (out_features,), jnp.float32, -bound2, bound2),
            wg=jax.random.uniform(kg, (cin, out_features), jnp.float32, -bound2, bound2),
            bg=jax.random.uniform(kbg, (out_features,), jnp.float32, -bound2, bound2),
        ))
    params["aoa"] = layers
    return params


# ----------------------------------------------------------------------------
# Forward (wrapper takes / returns NCHW like the PyTorch module).
# ----------------------------------------------------------------------------
def up_triangle1_forward(params, x_nchw, ctx_nchw):
    N, Cin, H, W = x_nchw.shape
    Cout = params["up_b"].shape[0]
    Nc, Cc, Hc, Wc = ctx_nchw.shape
    assert Nc == N and Cc == Cout and Hc == 2 * H and Wc == 2 * W
    num_layers = len(params["aoa"])
    out_dtype = x_nchw.dtype
    out_itemsize = jnp.dtype(out_dtype).itemsize

    lane_target, vmem_limit, min_steps = _chip_config()

    M = N * H * W                                       # input pixels
    G = lane_target // math.gcd(4 * Cout, lane_target)  # input pixels per packed row
    P = 4 * G                                           # output pixels per packed row
    ncols = P * Cout                                    # multiple of lane_target
    kx = G * Cin

    # --- pack weights once (block-diagonal over packed pixels, bf16) --------
    # up weight (Cin, Cout, 2, 2) -> (Cin, di, dj, co) -> (Cin, 4*Cout)
    up_w_flat = jnp.transpose(params["up_w"], (0, 2, 3, 1)).reshape(Cin, 4 * Cout)
    up_w_pk = _block_diag(up_w_flat, G).astype(jnp.bfloat16)           # [kx, ncols]
    up_b_pk = jnp.tile(jnp.tile(params["up_b"], 4), G).reshape(1, ncols)  # f32

    layer_args = []
    for layer in params["aoa"]:
        wi_h, wi_c = layer["wi"][:Cout], layer["wi"][Cout:]   # concat([h, ctx]) split
        wg_h, wg_c = layer["wg"][:Cout], layer["wg"][Cout:]
        # merged along the output dim: [info | gate]  -> (ncols, 2*ncols)
        w_h = jnp.concatenate(
            [_block_diag(wi_h, P), _block_diag(wg_h, P)], axis=1).astype(jnp.bfloat16)
        w_c = jnp.concatenate(
            [_block_diag(wi_c, P), _block_diag(wg_c, P)], axis=1).astype(jnp.bfloat16)
        b = jnp.concatenate(
            [jnp.tile(layer["bi"], P), jnp.tile(layer["bg"], P)]).reshape(1, 2 * ncols)
        layer_args += [w_h, w_c, b]

    weight_bytes = (_nbytes(up_w_pk) + _nbytes(up_b_pk)
                    + sum(_nbytes(a) for a in layer_args))

    # --- pack activations in bf16 (halves the boundary-repack HBM traffic) --
    x_flat = jnp.transpose(x_nchw.astype(jnp.bfloat16), (0, 2, 3, 1)).reshape(M, Cin)
    # ctx row m matches input pixel m: layout (n,h,w) rows x (di,dj,co) cols
    ctx_flat = jnp.transpose(
        ctx_nchw.astype(jnp.bfloat16).reshape(N, Cout, H, 2, W, 2),
        (0, 2, 4, 3, 5, 1)).reshape(M, 4 * Cout)

    rows0 = -(-M // G)
    tm = _pick_tm(rows0, kx, ncols, out_itemsize, weight_bytes, vmem_limit, min_steps)
    rows = -(-rows0 // tm) * tm                          # pad rows to a tile multiple
    m_pad = rows * G
    if m_pad != M:
        x_flat = jnp.pad(x_flat, ((0, m_pad - M), (0, 0)))
        ctx_flat = jnp.pad(ctx_flat, ((0, m_pad - M), (0, 0)))
    x_pk = x_flat.reshape(rows, kx)
    ctx_pk = ctx_flat.reshape(rows, ncols)

    grid = rows // tm

    # NOTE: weight/bias specs are grid-invariant; on v7x their footprint could
    # be halved further with single-buffering, which the VMEM budget above
    # already conservatively accounts for.
    in_specs = [
        pl.BlockSpec((tm, kx), lambda i: (i, 0)),
        pl.BlockSpec((tm, ncols), lambda i: (i, 0)),
        pl.BlockSpec((kx, ncols), lambda i: (0, 0)),      # weights: VMEM-resident
        pl.BlockSpec((1, ncols), lambda i: (0, 0)),
    ]
    for _ in range(num_layers):
        in_specs += [
            pl.BlockSpec((ncols, 2 * ncols), lambda i: (0, 0)),
            pl.BlockSpec((ncols, 2 * ncols), lambda i: (0, 0)),
            pl.BlockSpec((1, 2 * ncols), lambda i: (0, 0)),
        ]

    # Real algorithmic FLOPs (block-diagonal zeros excluded) and actual bytes.
    flops = int(2 * M * Cin * 4 * Cout + num_layers * 32 * M * Cout * Cout)
    transcendentals = int(num_layers * 2 * 4 * M * Cout)   # exp + recip per gate elem
    bytes_accessed = int(_nbytes(x_pk) + _nbytes(ctx_pk) + weight_bytes
                         + rows * ncols * out_itemsize)

    out = pl.pallas_call(
        functools.partial(_fused_kernel, num_layers),
        out_shape=jax.ShapeDtypeStruct((rows, ncols), out_dtype),
        grid_spec=pltpu.PrefetchScalarGridSpec(
            num_scalar_prefetch=0,
            grid=(grid,),
            in_specs=in_specs,
            out_specs=pl.BlockSpec((tm, ncols), lambda i: (i, 0)),
        ),
        compiler_params=pltpu.CompilerParams(
            dimension_semantics=("parallel",),
            vmem_limit_bytes=vmem_limit,
        ),
        cost_estimate=pl.CostEstimate(
            flops=flops,
            transcendentals=transcendentals,
            bytes_accessed=bytes_accessed),
    )(x_pk, ctx_pk, up_w_pk, up_b_pk, *layer_args)

    # unpack: [rows, P*Cout] -> [M, 4*Cout] -> NCHW (single boundary transpose)
    out = out.reshape(m_pad, 4 * Cout)[:M].reshape(N, H, W, 2, 2, Cout)
    out = jnp.transpose(out, (0, 5, 1, 3, 2, 4)).reshape(N, Cout, 2 * H, 2 * W)
    return out


# ----------------------------------------------------------------------------
# Pure-JAX f32 reference (pins down ordering-sensitive flattening / scatter).
# ----------------------------------------------------------------------------
def _reference_forward(params, x_nchw, ctx_nchw):
    N, Cin, H, W = x_nchw.shape
    Cout = params["up_b"].shape[0]
    x_nhwc = jnp.transpose(x_nchw, (0, 2, 3, 1))
    w = params["up_w"]                                        # [Cin, Cout, 2, 2]
    y = jnp.einsum("nhwi,iocd->nhwcdo", x_nhwc, w) + params["up_b"]
    y = jnp.transpose(y, (0, 1, 3, 2, 4, 5)).reshape(N, 2 * H, 2 * W, Cout)
    ctx = jnp.transpose(ctx_nchw, (0, 2, 3, 1))
    h = y
    for layer in params["aoa"]:
        cat = jnp.concatenate([h, ctx], axis=-1)
        info = cat @ layer["wi"] + layer["bi"]
        gate = jax.nn.sigmoid(cat @ layer["wg"] + layer["bg"])
        h = gate * info
    return jnp.transpose(h, (0, 3, 1, 2))


if __name__ == "__main__":
    key = jax.random.PRNGKey(0)
    in_features, out_features, num_layers = 4, 8, 1
    N, H, W = 2, 16, 16

    kx_, kc_, kp_ = jax.random.split(key, 3)
    x = jax.random.normal(kx_, (N, in_features, H, W), jnp.float32)            # NCHW
    ctx = jax.random.normal(kc_, (N, out_features, 2 * H, 2 * W), jnp.float32)

    params = init_up_triangle1_params(kp_, in_features, out_features, num_layers)

    fwd = jax.jit(functools.partial(up_triangle1_forward, params))
    out = fwd(x, ctx)
    jax.block_until_ready(out)
    assert out.shape == (N, out_features, 2 * H, 2 * W), out.shape

    # bf16 MXU operands with f32 accumulation -> compare against the f32
    # reference with a bf16-appropriate tolerance (numerics trade-off signed
    # off per the performance review).
    ref = _reference_forward(params, x, ctx)
    err = float(jnp.max(jnp.abs(out - ref)))
    assert jnp.allclose(out, ref, rtol=2e-2, atol=2e-2), f"max abs err {err}"
    print("KERNEL_OK")
</pallas_src>

<mosaic_0001>
module attributes {stable_mosaic.version = 11 : i64} {
  func.func @_fused_kernel(%arg0: i32, %arg1: memref<16x32xbf16, #tpu.memory_space<vmem>>, %arg2: memref<16x256xbf16, #tpu.memory_space<vmem>>, %arg3: memref<32x256xbf16, #tpu.memory_space<vmem>>, %arg4: memref<1x256xf32, #tpu.memory_space<vmem>>, %arg5: memref<256x512xbf16, #tpu.memory_space<vmem>>, %arg6: memref<256x512xbf16, #tpu.memory_space<vmem>>, %arg7: memref<1x512xf32, #tpu.memory_space<vmem>>, %arg8: memref<16x256xf32, #tpu.memory_space<vmem>>) attributes {dimension_semantics = [#tpu.dimension_semantics<parallel>], iteration_bounds = array<i64: 4>, scalar_prefetch = 0 : i64, scratch_operands = 0 : i64, tpu.core_type = #tpu.core_type<tc>, window_params = [{transform_indices = @transform_0, window_bounds = array<i64: 16, 32>}, {transform_indices = @transform_1, window_bounds = array<i64: 16, 256>}, {pipeline_mode = #tpu.pipeline_mode<synchronous>, transform_indices = @transform_2, window_bounds = array<i64: 32, 256>}, {pipeline_mode = #tpu.pipeline_mode<synchronous>, transform_indices = @transform_3, window_bounds = array<i64: 1, 256>}, {pipeline_mode = #tpu.pipeline_mode<synchronous>, transform_indices = @transform_4, window_bounds = array<i64: 256, 512>}, {pipeline_mode = #tpu.pipeline_mode<synchronous>, transform_indices = @transform_5, window_bounds = array<i64: 256, 512>}, {pipeline_mode = #tpu.pipeline_mode<synchronous>, transform_indices = @transform_6, window_bounds = array<i64: 1, 512>}, {transform_indices = @transform_7, window_bounds = array<i64: 16, 256>}]} {
    %c0 = arith.constant 0 : index
    %c0_0 = arith.constant 0 : index
    %0 = vector.load %arg1[%c0, %c0_0] : memref<16x32xbf16, #tpu.memory_space<vmem>>, vector<16x32xbf16>
    %c0_1 = arith.constant 0 : index
    %c0_2 = arith.constant 0 : index
    %1 = vector.load %arg2[%c0_1, %c0_2] : memref<16x256xbf16, #tpu.memory_space<vmem>>, vector<16x256xbf16>
    %c0_3 = arith.constant 0 : index
    %c0_4 = arith.constant 0 : index
    %2 = vector.load %arg3[%c0_3, %c0_4] : memref<32x256xbf16, #tpu.memory_space<vmem>>, vector<32x256xbf16>
    %cst = arith.constant dense<0.000000e+00> : vector<16x256xf32>
    %3 = tpu.matmul %0, %2, %cst {dimension_numbers = #tpu.dot_dimension_numbers<[1], [0], [0], [1], [0, 0, 1, 1], [], []>} : vector<16x32xbf16>, vector<32x256xbf16>, vector<16x256xf32> -> vector<16x256xf32>
    %c0_5 = arith.constant 0 : index
    %c0_6 = arith.constant 0 : index
    %4 = vector.load %arg4[%c0_5, %c0_6] : memref<1x256xf32, #tpu.memory_space<vmem>>, vector<1x256xf32>
    %5 = vector.broadcast %4 : vector<1x256xf32> to vector<16x256xf32>
    %6 = arith.addf %3, %5 : vector<16x256xf32>
    %7 = arith.truncf %6 : vector<16x256xf32> to vector<16x256xbf16>
    %c0_7 = arith.constant 0 : index
    %c0_8 = arith.constant 0 : index
    %8 = vector.load %arg5[%c0_7, %c0_8] : memref<256x512xbf16, #tpu.memory_space<vmem>>, vector<256x512xbf16>
    %cst_9 = arith.constant dense<0.000000e+00> : vector<16x512xf32>
    %9 = tpu.matmul %7, %8, %cst_9 {dimension_numbers = #tpu.dot_dimension_numbers<[1], [0], [0], [1], [0, 0, 1, 1], [], []>} : vector<16x256xbf16>, vector<256x512xbf16>, vector<16x512xf32> -> vector<16x512xf32>
    %c0_10 = arith.constant 0 : index
    %c0_11 = arith.constant 0 : index
    %10 = vector.load %arg6[%c0_10, %c0_11] : memref<256x512xbf16, #tpu.memory_space<vmem>>, vector<256x512xbf16>
    %cst_12 = arith.constant dense<0.000000e+00> : vector<16x512xf32>
    %11 = tpu.matmul %1, %10, %cst_12 {dimension_numbers = #tpu.dot_dimension_numbers<[1], [0], [0], [1], [0, 0, 1, 1], [], []>} : vector<16x256xbf16>, vector<256x512xbf16>, vector<16x512xf32> -> vector<16x512xf32>
    %12 = arith.addf %9, %11 : vector<16x512xf32>
    %c0_13 = arith.constant 0 : index
    %c0_14 = arith.constant 0 : index
    %13 = vector.load %arg7[%c0_13, %c0_14] : memref<1x512xf32, #tpu.memory_space<vmem>>, vector<1x512xf32>
    %14 = vector.broadcast %13 : vector<1x512xf32> to vector<16x512xf32>
    %15 = arith.addf %12, %14 : vector<16x512xf32>
    %16 = vector.extract_strided_slice %15 {offsets = [0, 0], sizes = [16, 256], strides = [1, 1]} : vector<16x512xf32> to vector<16x256xf32>
    %17 = vector.extract_strided_slice %15 {offsets = [0, 256], sizes = [16, 256], strides = [1, 1]} : vector<16x512xf32> to vector<16x256xf32>
    %cst_15 = arith.constant 0.000000e+00 : f32
    %18 = vector.broadcast %cst_15 : f32 to vector<16x256xf32>
    %19 = arith.subf %18, %17 : vector<16x256xf32>
    %20 = math.exp %19 : vector<16x256xf32>
    %cst_16 = arith.constant 1.000000e+00 : f32
    %21 = vector.broadcast %cst_16 : f32 to vector<16x256xf32>
    %22 = arith.addf %21, %20 : vector<16x256xf32>
    %23 = tpu.reciprocal %22 {approx = true} : vector<16x256xf32> -> vector<16x256xf32>
    %24 = arith.mulf %16, %23 : vector<16x256xf32>
    %c0_17 = arith.constant 0 : index
    %c0_18 = arith.constant 0 : index
    %25 = vector.load %arg8[%c0_17, %c0_18] : memref<16x256xf32, #tpu.memory_space<vmem>>, vector<16x256xf32>
    tpu.vector_store %arg8[%c0_17, %c0_18], %24 {strides = array<i32>} : memref<16x256xf32, #tpu.memory_space<vmem>>, vector<16x256xf32>,
    return
  }
  func.func @transform_0(%arg0: i32) -> (i32, i32) {
    %c0_i32 = arith.constant 0 : i32
    %c0_i32_0 = arith.constant 0 : i32
    return %arg0, %c0_i32 : i32, i32
  }
  func.func @transform_1(%arg0: i32) -> (i32, i32) {
    %c0_i32 = arith.constant 0 : i32
    %c0_i32_0 = arith.constant 0 : i32
    return %arg0, %c0_i32 : i32, i32
  }
  func.func @transform_2(%arg0: i32) -> (i32, i32) {
    %c0_i32 = arith.constant 0 : i32
    %c0_i32_0 = arith.constant 0 : i32
    %c0_i32_1 = arith.constant 0 : i32
    return %c0_i32, %c0_i32_0 : i32, i32
  }
  func.func @transform_3(%arg0: i32) -> (i32, i32) {
    %c0_i32 = arith.constant 0 : i32
    %c0_i32_0 = arith.constant 0 : i32
    %c0_i32_1 = arith.constant 0 : i32
    return %c0_i32, %c0_i32_0 : i32, i32
  }
  func.func @transform_4(%arg0: i32) -> (i32, i32) {
    %c0_i32 = arith.constant 0 : i32
    %c0_i32_0 = arith.constant 0 : i32
    %c0_i32_1 = arith.constant 0 : i32
    return %c0_i32, %c0_i32_0 : i32, i32
  }
  func.func @transform_5(%arg0: i32) -> (i32, i32) {
    %c0_i32 = arith.constant 0 : i32
    %c0_i32_0 = arith.constant 0 : i32
    %c0_i32_1 = arith.constant 0 : i32
    return %c0_i32, %c0_i32_0 : i32, i32
  }
  func.func @transform_6(%arg0: i32) -> (i32, i32) {
    %c0_i32 = arith.constant 0 : i32
    %c0_i32_0 = arith.constant 0 : i32
    %c0_i32_1 = arith.constant 0 : i32
    return %c0_i32, %c0_i32_0 : i32, i32
  }
  func.func @transform_7(%arg0: i32) -> (i32, i32) {
    %c0_i32 = arith.constant 0 : i32
    %c0_i32_0 = arith.constant 0 : i32
    return %arg0, %c0_i32 : i32, i32
  }
}

</mosaic_0001>

<bundles_post_ra>
// kernel: tile.26
= control target key start
LH: loop header
LB: loop body
LE: loop exit
PB: predicated region body
PF: predicated region fallthrough
CT: control target
= control target key end

     0   :  { %s40_s0 = inlined_call_operand.vmem [shape: f32[8], index: 0, kind: input, shape index: {}]   ;;  %s41_s1 = inlined_call_operand.vmem [shape: f32[32,8], index: 1, kind: output, shape index: {}]  }
   0x1   :  { %v4_v0 = vld [vmem:[%s40_s0] ss:$0 sm:$0xff] }
   0x2   :  { %5 = vst [vmem:[%s41_s1] sm:$0xff] %v4_v0  ;;  %12 = vst [vmem:[%s41_s1 + $0x8] sm:$0xff] %v4_v0 }
   0x3   :  { %13 = vst [vmem:[%s41_s1 + $0x10] sm:$0xff] %v4_v0  ;;  %14 = vst [vmem:[%s41_s1 + $0x18] sm:$0xff] %v4_v0 }

// kernel: tile.27
= control target key start
LH: loop header
LB: loop body
LE: loop exit
PB: predicated region body
PF: predicated region fallthrough
CT: control target
= control target key end

     0   :  { %s7_s6 = smov 3  ;;  %s21_s9 = smov 3  ;;  %vm4_vm0 = vcmask 64512   ;;  %vm11_vm1 = vcmask 1048512   ;;  %vm18_vm2 = vcmask 982912   ;;  %vm25_vm3 = vcmask 917312   ;;  %s223_s0 = inlined_call_operand.vmem [shape: f32[32,8], index: 0, kind: input, shape index: {}]   ;;  %s224_s1 = inlined_call_operand.vmem [shape: f32[256], index: 1, kind: output, shape index: {}]  }
   0x1   :  { %v117_v0 = vld [vmem:[%s223_s0 + $0xf] ss:$16 sm:%s7_s6]   ;;  %s147_s10 = smov 120   ;;  %v119_v1 = vld [vmem:[%s223_s0 + $0xd] ss:$16 sm:%s21_s9]   ;;  %s14_s13 = smov 3 }
   0x2   :  { %9 = vrot.lane.b32.xlu0 %v117_v0, %s147_s10  ;;  %s148_s14 = smov 104   ;;  %v118_v2 = vld [vmem:[%s223_s0 + $0xe] ss:$16 sm:%s14_s13]   ;;  %s28_s17 = smov 3  ;;  %vm32_vm4 = vcmask 851712   ;;  %vm39_vm5 = vcmask 786112  }
   0x3   :  { %23 = vrot.lane.b32.xlu1 %v119_v1, %s148_s14  ;;  %v120_v3 = vld [vmem:[%s223_s0 + $0xc] ss:$16 sm:%s28_s17]   ;;  %s35_s20 = smov 3  ;;  %s42_s21 = smov 3  ;;  %vm46_vm6 = vcmask 720512   ;;  %vm53_vm7 = vcmask 654912  }
   0x4   :  { %s149_s22 = smov 112   ;;  %s150_s23 = smov 96   ;;  %v121_v4 = vld [vmem:[%s223_s0 + $0xb] ss:$16 sm:%s35_s20]   ;;  %v122_v5 = vld [vmem:[%s223_s0 + $0xa] ss:$16 sm:%s42_s21]  }
   0x5   :  { %s49_s28 = smov 3  ;;  %s56_s29 = smov 3  ;;  %vm60_vm8 = vcmask 589312   ;;  %vm67_vm9 = vcmask 523712   ;;  %vm74_vm10 = vcmask 458112   ;;  %vm81_vm11 = vcmask 392512  }
   0x6   :  { %16 = vrot.lane.b32.xlu0 %v118_v2, %s149_s22  ;;  %s151_s30 = smov 88   ;;  %s152_s2 = smov 80   ;;  %v123_v6 = vld [vmem:[%s223_s0 + $0x9] ss:$16 sm:%s49_s28]   ;;  %vm88_vm12 = vcmask 326912   ;;  %vm95_vm13 = vcmask 261312  }
   0x7   :  { %30 = vrot.lane.b32.xlu1 %v120_v3, %s150_s23  ;;  %v124_v7 = vld [vmem:[%s223_s0 + $0x8] ss:$16 sm:%s56_s29]   ;;  %s63_s7 = smov 3  ;;  %s70_s8 = smov 3  ;;  %vm102_vm14 = vcmask 195712   ;;  %vm109_vm15 = vcmask 130112  }
   0x8   :  { %s153_s9 = smov 72   ;;  %s154_s10 = smov 64   ;;  %v125_v8 = vld [vmem:[%s223_s0 + $0x7] ss:$16 sm:%s63_s7]   ;;  %v126_v9 = vld [vmem:[%s223_s0 + $0x6] ss:$16 sm:%s70_s8]  }
   0x9   :  { %s2_s13 = smov 3  ;;  %s77_s16 = smov 3 }
   0xa   :  { %37 = vrot.lane.b32.xlu0 %v121_v4, %s151_s30  ;;  %v3_v10 = vld [vmem:[%s223_s0] ss:$16 sm:%s2_s13]   ;;  %s84_s19 = smov 3  ;;  %s155_s20 = smov 56  }
   0xb   :  { %44 = vrot.lane.b32.xlu1 %v122_v5, %s152_s2  ;;  %5 = vst.msk [vmem:[#allocation0] sm:$0x3] %vm4_vm0, %v3_v10   ;;  %s156_s21 = smov 48   ;;  %v127_v11 = vld [vmem:[%s223_s0 + $0x5] ss:$16 sm:%s77_s16]   ;;  %s91_s26 = smov 3 }
   0xc   :  { %v128_v12 = vld [vmem:[%s223_s0 + $0x4] ss:$16 sm:%s84_s19]   ;;  %s98_s27 = smov 3  ;;  %s157_s28 = smov 40   ;;  %v129_v13 = vld [vmem:[%s223_s0 + $0x3] ss:$16 sm:%s91_s26]  }
   0xd   :  { %s158_s29 = smov 32   ;;  %v130_v14 = vld [vmem:[%s223_s0 + $0x2] ss:$16 sm:%s98_s27]   ;;  %s105_s5 = smov 3 }
   0xe   :  { %51 = vrot.lane.b32.xlu0 %v123_v6, %s153_s9  ;;  %s159_s6 = smov 24   ;;  %s160_s7 = smov 16   ;;  %v131_v15 = vld [vmem:[%s223_s0 + $0x1] ss:$16 sm:%s105_s5]  }
   0xf   :  { %58 = vrot.lane.b32.xlu1 %v124_v7, %s154_s10  ;;  %s161_s0 = smov 8  }
  0x12   :  { %65 = vrot.lane.b32.xlu0 %v125_v8, %s155_s20 }
  0x13   :  { %72 = vrot.lane.b32.xlu1 %v126_v9, %s156_s21 }
  0x16   :  { %79 = vrot.lane.b32.xlu0 %v127_v11, %s157_s28 }
  0x17   :  { %86 = vrot.lane.b32.xlu1 %v128_v12, %s158_s29 }
  0x1a   :  { %93 = vrot.lane.b32.xlu0 %v129_v13, %s159_s6 }
  0x1b   :  { %100 = vrot.lane.b32.xlu1 %v130_v14, %s160_s7 }
  0x1e   :  { %107 = vrot.lane.b32.xlu0 %v131_v15, %s161_s0 }
  0x74   :  { %v10_v16 = vpop.permute.xlu0 %9  }
  0x75   :  { %12 = vst.msk [vmem:[#allocation0] sm:$0x3] %vm11_vm1, %v10_v16   ;;  %v24_v17 = vpop.permute.xlu1 %23  }
  0x78   :  { %v17_v18 = vpop.permute.xlu0 %16  }
  0x79   :  { %19 = vst.msk [vmem:[#allocation0] sm:$0x3] %vm18_vm2, %v17_v18   ;;  %v31_v19 = vpop.permute.xlu1 %30  }
  0x7a   :  { %26 = vst.msk [vmem:[#allocation0] sm:$0x3] %vm25_vm3, %v24_v17  }
  0x7b   :  { %33 = vst.msk [vmem:[#allocation0] sm:$0x3] %vm32_vm4, %v31_v19  }
  0x7c   :  { %v38_v20 = vpop.permute.xlu0 %37  }
  0x7d   :  { %40 = vst.msk [vmem:[#allocation0] sm:$0x3] %vm39_vm5, %v38_v20   ;;  %v45_v21 = vpop.permute.xlu1 %44  }
  0x7e   :  { %47 = vst.msk [vmem:[#allocation0] sm:$0x3] %vm46_vm6, %v45_v21  }
  0x80   :  { %v52_v22 = vpop.permute.xlu0 %51  }
  0x81   :  { %54 = vst.msk [vmem:[#allocation0] sm:$0x3] %vm53_vm7, %v52_v22   ;;  %v59_v23 = vpop.permute.xlu1 %58  }
  0x82   :  { %61 = vst.msk [vmem:[#allocation0] sm:$0x3] %vm60_vm8, %v59_v23  }
  0x84   :  { %v66_v24 = vpop.permute.xlu0 %65  }
  0x85   :  { %68 = vst.msk [vmem:[#allocation0] sm:$0x3] %vm67_vm9, %v66_v24   ;;  %v73_v25 = vpop.permute.xlu1 %72  }
  0x86   :  { %75 = vst.msk [vmem:[#allocation0] sm:$0x3] %vm74_vm10, %v73_v25  }
  0x88   :  { %v80_v26 = vpop.permute.xlu0 %79  }
  0x89   :  { %82 = vst.msk [vmem:[#allocation0] sm:$0x3] %vm81_vm11, %v80_v26   ;;  %v87_v27 = vpop.permute.xlu1 %86  }
  0x8a   :  { %89 = vst.msk [vmem:[#allocation0] sm:$0x3] %vm88_vm12, %v87_v27  }
  0x8c   :  { %v94_v28 = vpop.permute.xlu0 %93  }
  0x8d   :  { %96 = vst.msk [vmem:[#allocation0] sm:$0x3] %vm95_vm13, %v94_v28   ;;  %v101_v29 = vpop.permute.xlu1 %100  }
  0x8e   :  { %103 = vst.msk [vmem:[#allocation0] sm:$0x3] %vm102_vm14, %v101_v29  }
  0x90   :  { %v108_v30 = vpop.permute.xlu0 %107  }
  0x91   :  { %110 = vst.msk [vmem:[#allocation0] sm:$0x3] %vm109_vm15, %v108_v30  }
  0x98   :  { %v114_v31 = vld [vmem:[#allocation0] sm:$0x3] }
  0x99   :  { %116 = vst [vmem:[%s224_s1] sm:$0x3] %v114_v31 }

// kernel: tile.18
= control target key start
LH: loop header
LB: loop body
LE: loop exit
PB: predicated region body
PF: predicated region fallthrough
CT: control target
= control target key end

     0   :  { %s22_s0 = inlined_call_operand.vmem [shape: f32[8], index: 0, kind: input, shape index: {}]   ;;  %s23_s1 = inlined_call_operand.vmem [shape: f32[4,8], index: 1, kind: output, shape index: {}]  }
   0x1   :  { %v4_v0 = vld [vmem:[%s22_s0] ss:$0 sm:$0xff] }
   0x2   :  { %5 = vst [vmem:[%s23_s1] sm:$0xf] %v4_v0 }

// kernel: tile.21
= control target key start
LH: loop header
LB: loop body
LE: loop exit
PB: predicated region body
PF: predicated region fallthrough
CT: control target
= control target key end

     0   :  { %vm7_vm0 = vcmask 64512   ;;  %s37_s8 = smov 8   ;;  %s38_s9 = smov 16   ;;  %vm13_vm1 = vcmask 261312   ;;  %vm19_vm2 = vcmask 195712   ;;  %vm25_vm3 = vcmask 130112   ;;  %s55_s0 = inlined_call_operand.vmem [shape: f32[4,8], index: 0, kind: input, shape index: {}]   ;;  %s56_s1 = inlined_call_operand.vmem [shape: f32[32], index: 1, kind: output, shape index: {}]  }
   0x1   :  { %v4_v0 = vld [vmem:[%s55_s0] sm:$0xf]  ;;  %s36_s0 = smov 24  }
   0x2   :  { %5 = vst [vmem:[#allocation1] sm:$0xf] %v4_v0 }
   0x9   :  { %v10_v1 = vld [vmem:[#allocation1 + $0x3] sm:$0x1]   ;;  %v22_v2 = vld [vmem:[#allocation1 + $0x1] sm:$0x1]   ;;  %v6_v3 = vld [vmem:[#allocation1] sm:$0x1]  }
   0xa   :  { %11 = vrot.lane.b32.xlu0 %v10_v1, %s36_s0  ;;  %23 = vrot.lane.b32.xlu1 %v22_v2, %s37_s8  ;;  %v16_v4 = vld [vmem:[#allocation1 + $0x2] sm:$0x1]   ;;  %8 = vst.msk [vmem:[#allocation0] sm:$0x1] %vm7_vm0, %v6_v3  }
   0xe   :  { %17 = vrot.lane.b32.xlu0 %v16_v4, %s38_s9 }
  0x7c   :  { %v12_v5 = vpop.permute.xlu0 %11   ;;  %v24_v6 = vpop.permute.xlu1 %23  }
  0x7d   :  { %14 = vst.msk [vmem:[#allocation0] sm:$0x1] %vm13_vm1, %v12_v5  }
  0x80   :  { %v18_v7 = vpop.permute.xlu0 %17  }
  0x81   :  { %20 = vst.msk [vmem:[#allocation0] sm:$0x1] %vm19_vm2, %v18_v7  }
  0x82   :  { %26 = vst.msk [vmem:[#allocation0] sm:$0x1] %vm25_vm3, %v24_v6  }
  0x89   :  { %v30_v8 = vld [vmem:[#allocation0] sm:$0x1] }
  0x8a   :  { %32 = vst [vmem:[%s56_s1] sm:$0x1] %v30_v8 }

// kernel: tile.22
= control target key start
LH: loop header
LB: loop body
LE: loop exit
PB: predicated region body
PF: predicated region fallthrough
CT: control target
= control target key end

     0   :  { %s22_s0 = inlined_call_operand.vmem [shape: f32[32], index: 0, kind: input, shape index: {}]   ;;  %s23_s1 = inlined_call_operand.vmem [shape: f32[8,32], index: 1, kind: output, shape index: {}]  }
   0x1   :  { %v4_v0 = vld [vmem:[%s22_s0] ss:$0 sm:$0xff] }
   0x2   :  { %5 = vst [vmem:[%s23_s1] sm:$0xff] %v4_v0 }

// kernel: tile.23
= control target key start
LH: loop header
LB: loop body
LE: loop exit
PB: predicated region body
PF: predicated region fallthrough
CT: control target
= control target key end

     0   :  { %s7_s6 = smov 3  ;;  %s14_s9 = smov 3  ;;  %vm4_vm0 = vcmask 261120   ;;  %vm11_vm1 = vcmask 1048320   ;;  %vm18_vm2 = vcmask 785920   ;;  %vm25_vm3 = vcmask 523520   ;;  %s76_s0 = inlined_call_operand.vmem [shape: f32[8,32], index: 0, kind: input, shape index: {}]   ;;  %s77_s1 = inlined_call_operand.vmem [shape: f32[1,256], index: 1, kind: output, shape index: {}]  }
   0x1   :  { %v38_v0 = vld [vmem:[%s76_s0 + $0x3] ss:$4 sm:%s7_s6]   ;;  %s45_s10 = smov 96   ;;  %s21_s11 = smov 3  ;;  %v39_v1 = vld [vmem:[%s76_s0 + $0x2] ss:$4 sm:%s14_s9]  }
   0x2   :  { %9 = vrot.lane.b32.xlu0 %v38_v0, %s45_s10  ;;  %v40_v2 = vld [vmem:[%s76_s0 + $0x1] ss:$4 sm:%s21_s11]   ;;  %s2_s16 = smov 3  ;;  %s46_s17 = smov 32  }
   0x3   :  { %23 = vrot.lane.b32.xlu1 %v40_v2, %s46_s17  ;;  %v3_v3 = vld [vmem:[%s76_s0] ss:$4 sm:%s2_s16]   ;;  %s47_s0 = smov 64  }
   0x4   :  { %5 = vst.msk [vmem:[#allocation0] ss:$8 sm:$0x3] %vm4_vm0, %v3_v3  }
   0x6   :  { %16 = vrot.lane.b32.xlu0 %v39_v1, %s47_s0 }
  0x74   :  { %v10_v4 = vpop.permute.xlu0 %9  }
  0x75   :  { %12 = vst.msk [vmem:[#allocation0] ss:$8 sm:$0x3] %vm11_vm1, %v10_v4   ;;  %v24_v5 = vpop.permute.xlu1 %23  }
  0x78   :  { %v17_v6 = vpop.permute.xlu0 %16  }
  0x79   :  { %19 = vst.msk [vmem:[#allocation0] ss:$8 sm:$0x3] %vm18_vm2, %v17_v6  }
  0x7a   :  { %26 = vst.msk [vmem:[#allocation0] ss:$8 sm:$0x3] %vm25_vm3, %v24_v5  }
  0x81   :  { %v30_v7 = vld [vmem:[#allocation0] sm:$0x1]  ;;  %v34_v8 = vld [vmem:[#allocation0 + $0x8] sm:$0x1] }
  0x82   :  { %32 = vst [vmem:[%s77_s1] sm:$0x1] %v30_v7  ;;  %41 = vst [vmem:[%s77_s1 + $0x1] sm:$0x1] %v34_v8 }

// kernel: up_triangle1_forward.1
= control target key start
LH: loop header
LB: loop body
LE: loop exit
PB: predicated region body
PF: predicated region fallthrough
CT: control target
= control target key end

     0   :  { %s1919_s24 = smov 0   ;;  %s2356_s0 = inlined_call_operand.vmem [shape: bf16[64,32], index: 0, kind: input, shape index: {}]   ;;  %s2357_s1 = inlined_call_operand.vmem [shape: bf16[64,256], index: 1, kind: input, shape index: {}]   ;;  %s2358_s2 = inlined_call_operand.vmem [shape: bf16[32,256], index: 2, kind: input, shape index: {}]   ;;  %s2359_s3 = inlined_call_operand.vmem [shape: f32[1,256], index: 3, kind: input, shape index: {}]   ;;  %s2360_s4 = inlined_call_operand.vmem [shape: bf16[256,512], index: 4, kind: input, shape index: {}]   ;;  %s2361_s5 = inlined_call_operand.vmem [shape: bf16[256,512], index: 5, kind: input, shape index: {}]   ;;  %s2362_s6 = inlined_call_operand.vmem [shape: f32[1,512], index: 6, kind: input, shape index: {}]   ;;  %s2363_s7 = inlined_call_operand.vmem [shape: f32[64,256], index: 7, kind: output, shape index: {}]  }
   0x1 LB: > { %s1482_s25 = sadd.s32 4294967295, %s1876_s24   ;;  %p1486_p0 = scmp.ge.s32.totalorder %s1876_s24, 1  ;;  %s1876_s24 = sphi %s1919_s24, %s17_s24  }
   0x2   : > { %p250_p1 = scmp.lt.s32.totalorder %s1876_s24, 5 }
   0x4   : > { %p251_p2 = pnand %p1486_p0, %p250_p1 }
   0x5   : > { %v1652_v0 = vld [vmem:[%s2358_s2 + $0x4] ss:$8 sps:$4 sm:$0xff] (!%p251_p2)   ;;  %s1487_s28 = sshll.u32 (!%p251_p2), %s1482_s25, 1  ;;  %v1654_v1 = vld [vmem:[%s2358_s2] ss:$8 sps:$4 sm:$0xff] (!%p251_p2)   ;;  %v1878_v2 = vmov (!%p251_p2), 0  }
   0x6   : > { %254 = sbr.rel (%p251_p2) target bundleno = 485 (0x1e5), region = 48  ;;  %391 = vmatprep.mubr.bf16.mxu0 (!%p251_p2), %v1878_v2  ;;  %p290_p3 = scmp.lt.s32.totalorder (!%p251_p2), %s1487_s28, 7  ;;  %359 = vmatprep.subr.bf16.mxu0 (!%p251_p2), %v1652_v0  ;;  %v1655_v3 = vld [vmem:[%s2358_s2 + $0x14] ss:$8 sps:$4 sm:$0xff] (!%p251_p2)   ;;  %v1657_v4 = vld [vmem:[%s2358_s2 + $0x10] ss:$8 sps:$4 sm:$0xff] (!%p251_p2)  }
   0x7   : > { %360 = vmatpush1.bf16.msra.mxu0 (!%p251_p2), %v1654_v1  ;;  %v1659_v5 = vld [vmem:[%s2361_s5 + $0x4] ss:$16 sps:$4 sm:$0xff] (!%p251_p2)   ;;  %v1663_v6 = vld [vmem:[%s2361_s5 + $0xc] ss:$16 sps:$4 sm:$0xff] (!%p251_p2)   ;;  %v1661_v7 = vld [vmem:[%s2361_s5 + $0x8] ss:$16 sps:$4 sm:$0xff] (!%p251_p2)  }
   0x8   : > { %361 = vmatprep.subr.bf16.mxu0 (!%p251_p2), %v1655_v3  ;;  %862 = vmatprep.subr.bf16.mxu1 (!%p251_p2), %v1659_v5  ;;  %v1664_v8 = vld [vmem:[%s2361_s5] ss:$16 sps:$4 sm:$0xff] (!%p251_p2)   ;;  %v1665_v9 = vld [vmem:[%s2361_s5 + $0x24] ss:$16 sps:$4 sm:$0xff] (!%p251_p2)   ;;  %vm355_vm0 = vcmask (!%p251_p2), 261120  }
   0x9   : > { %863 = vmatpush1.bf16.msra.mxu1 (!%p251_p2), %v1664_v8  ;;  %v1669_v11 = vld [vmem:[%s2361_s5 + $0x2c] ss:$16 sps:$4 sm:$0xff] (!%p251_p2)   ;;  %v1670_v12 = vld [vmem:[%s2361_s5 + $0x20] ss:$16 sps:$4 sm:$0xff] (!%p251_p2)   ;;  %v1671_v13 = vld [vmem:[%s2361_s5 + $0x44] ss:$16 sps:$4 sm:$0xff] (!%p251_p2)  }
   0xa   : > { %864 = vmatprep.subr.bf16.mxu1 (!%p251_p2), %v1665_v9  ;;  %v1667_v14 = vld [vmem:[%s2361_s5 + $0x28] ss:$16 sps:$4 sm:$0xff] (!%p251_p2)   ;;  %v1675_v15 = vld [vmem:[%s2361_s5 + $0x4c] ss:$16 sps:$4 sm:$0xff] (!%p251_p2)   ;;  %v1676_v16 = vld [vmem:[%s2361_s5 + $0x40] ss:$16 sps:$4 sm:$0xff] (!%p251_p2)  }
   0xb   : > { %362 = vmatpush1.bf16.msra.mxu0 (!%p251_p2), %v1657_v4  ;;  %v1677_v17 = vld [vmem:[%s2361_s5 + $0x64] ss:$16 sps:$4 sm:$0xff] (!%p251_p2)   ;;  %v1673_v18 = vld [vmem:[%s2361_s5 + $0x48] ss:$16 sps:$4 sm:$0xff] (!%p251_p2)   ;;  %v1682_v19 = vld [vmem:[%s2361_s5 + $0x60] ss:$16 sps:$4 sm:$0xff] (!%p251_p2)  }
   0xc   : > { %905 = vmatprep.subr.bf16.mxu0 (!%p251_p2), %v1663_v6  ;;  %v1681_v20 = vld [vmem:[%s2361_s5 + $0x6c] ss:$16 sps:$4 sm:$0xff] (!%p251_p2)   ;;  %v1683_v21 = vld [vmem:[%s2361_s5 + $0x84] ss:$16 sps:$4 sm:$0xff] (!%p251_p2)   ;;  %v1679_v22 = vld [vmem:[%s2361_s5 + $0x68] ss:$16 sps:$4 sm:$0xff] (!%p251_p2)  }
   0xd   : > { %s2365_s28 = smov (!%p290_p3, %s1487_s28), 7  ;;  %865 = vmatpush1.bf16.msra.mxu1 %v1670_v12  ;;  %v1687_v23 = vld [vmem:[%s2361_s5 + $0x8c] ss:$16 sps:$4 sm:$0xff]   ;;  %v1688_v24 = vld [vmem:[%s2361_s5 + $0x80] ss:$16 sps:$4 sm:$0xff]  }
   0xe   : > { %s1488_s16 = sshll.u32 %s2365_s28, 2  ;;  %866 = vmatprep.subr.bf16.mxu1 %v1671_v13  ;;  %v1689_v25 = vld [vmem:[%s2361_s5 + $0xa4] ss:$16 sps:$4 sm:$0xff]   ;;  %v1685_v26 = vld [vmem:[%s2361_s5 + $0x88] ss:$16 sps:$4 sm:$0xff]   ;;  %s1633_s12 = sshll.u32 %s2365_s28, 3 }
   0xf   : > { %s293_s23 = scalar_lea.vmem %s2356_s0, %s1488_s16  ;;  %v1694_v27 = vld [vmem:[%s2361_s5 + $0xa0] ss:$16 sps:$4 sm:$0xff]   ;;  %v1693_v28 = vld [vmem:[%s2361_s5 + $0xac] ss:$16 sps:$4 sm:$0xff]   ;;  %v1695_v29 = vld [vmem:[%s2361_s5 + $0xc4] ss:$16 sps:$4 sm:$0xff]  }
  0x10   : > { %v1658_v10 = vld [vmem:[%s293_s23] sm:$0xff]   ;;  %v1691_v30 = vld [vmem:[%s2361_s5 + $0xa8] ss:$16 sps:$4 sm:$0xff]   ;;  %v1699_v31 = vld [vmem:[%s2361_s5 + $0xcc] ss:$16 sps:$4 sm:$0xff]   ;;  %s2081_s23 = scalar_lea.vmem %s2357_s1, %s1633_s12  ;;  %s1634_s9 = sshll.u32 %s2365_s28, 4 }
  0x11   : > { %1500 = vmatmul.mubr.msk.bf16.vlgmr.msra.gmra.mrb[0].mxu0 %vm355_vm0, %v1658_v10  ;;  %867 = vmatpush1.bf16.msra.mxu1 %v1676_v16  ;;  %v1700_v32 = vld [vmem:[%s2361_s5 + $0xc0] ss:$16 sps:$4 sm:$0xff]   ;;  %v1701_v33 = vld [vmem:[%s2361_s5 + $0xe4] ss:$16 sps:$4 sm:$0xff]   ;;  %v1697_v34 = vld [vmem:[%s2361_s5 + $0xc8] ss:$16 sps:$4 sm:$0xff]   ;;  %s307_s11 = scalar_lea.vmem %s2363_s7, %s1634_s9 }
  0x12   : > { %906 = vmatpush1.bf16.msra.mxu0 %v1661_v7  ;;  %868 = vmatprep.subr.bf16.mxu1 %v1677_v17  ;;  %v1706_v35 = vld [vmem:[%s2361_s5 + $0xe0] ss:$16 sps:$4 sm:$0xff]   ;;  %v1705_v36 = vld [vmem:[%s2361_s5 + $0xec] ss:$16 sps:$4 sm:$0xff]   ;;  %v1707_v37 = vld [vmem:[%s2361_s5 + $0x104] ss:$16 sps:$4 sm:$0xff]  }
  0x13   : > { %907 = vmatprep.subr.bf16.mxu0 %v1669_v11  ;;  %v1703_v38 = vld [vmem:[%s2361_s5 + $0xe8] ss:$16 sps:$4 sm:$0xff]   ;;  %v1711_v39 = vld [vmem:[%s2361_s5 + $0x10c] ss:$16 sps:$4 sm:$0xff]   ;;  %v1712_v40 = vld [vmem:[%s2361_s5 + $0x100] ss:$16 sps:$4 sm:$0xff]  }
  0x14   : > { %v1713_v41 = vld [vmem:[%s2361_s5 + $0x124] ss:$16 sps:$4 sm:$0xff]   ;;  %v1709_v42 = vld [vmem:[%s2361_s5 + $0x108] ss:$16 sps:$4 sm:$0xff]   ;;  %v1718_v43 = vld [vmem:[%s2361_s5 + $0x120] ss:$16 sps:$4 sm:$0xff]  }
  0x15   : > { %869 = vmatpush1.bf16.msra.mxu1 %v1682_v19  ;;  %v1717_v44 = vld [vmem:[%s2361_s5 + $0x12c] ss:$16 sps:$4 sm:$0xff]   ;;  %v1719_v45 = vld [vmem:[%s2361_s5 + $0x144] ss:$16 sps:$4 sm:$0xff]   ;;  %v1715_v46 = vld [vmem:[%s2361_s5 + $0x128] ss:$16 sps:$4 sm:$0xff]  }
  0x16   : > { %908 = vmatpush1.bf16.msra.mxu0 %v1667_v14  ;;  %870 = vmatprep.subr.bf16.mxu1 %v1683_v21  ;;  %v1723_v47 = vld [vmem:[%s2361_s5 + $0x14c] ss:$16 sps:$4 sm:$0xff]   ;;  %v1724_v48 = vld [vmem:[%s2361_s5 + $0x140] ss:$16 sps:$4 sm:$0xff]   ;;  %v1725_v49 = vld [vmem:[%s2361_s5 + $0x164] ss:$16 sps:$4 sm:$0xff]  }
  0x17   : > { %909 = vmatprep.subr.bf16.mxu0 %v1675_v15  ;;  %v1721_v50 = vld [vmem:[%s2361_s5 + $0x148] ss:$16 sps:$4 sm:$0xff]   ;;  %v1730_v51 = vld [vmem:[%s2361_s5 + $0x160] ss:$16 sps:$4 sm:$0xff]   ;;  %v1757_v52 = vld [vmem:[%s2081_s23 + $0x4] ss:$8 sps:$4 sm:$0xff]  }
  0x18   : > { %v1729_v53 = vld [vmem:[%s2361_s5 + $0x16c] ss:$16 sps:$4 sm:$0xff]   ;;  %v1731_v54 = vld [vmem:[%s2361_s5 + $0x184] ss:$16 sps:$4 sm:$0xff]   ;;  %894 = vmatprep.mubr.bf16.mxu1 %v1757_v52  ;;  %937 = vmatprep.mubr.bf16.mxu0 %v1757_v52  ;;  %v1727_v55 = vld [vmem:[%s2361_s5 + $0x168] ss:$16 sps:$4 sm:$0xff]  }
  0x19   : > { %871 = vmatpush1.bf16.msra.mxu1 %v1688_v24  ;;  %v1736_v56 = vld [vmem:[%s2361_s5 + $0x180] ss:$16 sps:$4 sm:$0xff]   ;;  %v1735_v57 = vld [vmem:[%s2361_s5 + $0x18c] ss:$16 sps:$4 sm:$0xff]   ;;  %v1737_v58 = vld [vmem:[%s2361_s5 + $0x1a4] ss:$16 sps:$4 sm:$0xff]  }
  0x1a   : > { %910 = vmatpush1.bf16.msra.mxu0 %v1673_v18  ;;  %872 = vmatprep.subr.bf16.mxu1 %v1689_v25  ;;  %v1733_v59 = vld [vmem:[%s2361_s5 + $0x188] ss:$16 sps:$4 sm:$0xff]   ;;  %v1742_v60 = vld [vmem:[%s2361_s5 + $0x1a0] ss:$16 sps:$4 sm:$0xff]   ;;  %v1741_v61 = vld [vmem:[%s2361_s5 + $0x1ac] ss:$16 sps:$4 sm:$0xff]  }
  0x1b   : > { %911 = vmatprep.subr.bf16.mxu0 %v1681_v20  ;;  %v1743_v62 = vld [vmem:[%s2361_s5 + $0x1c4] ss:$16 sps:$4 sm:$0xff]   ;;  %v1739_v63 = vld [vmem:[%s2361_s5 + $0x1a8] ss:$16 sps:$4 sm:$0xff]   ;;  %v1748_v0 = vld [vmem:[%s2361_s5 + $0x1c0] ss:$16 sps:$4 sm:$0xff]  }
  0x1c   : > { %v1747_v1 = vld [vmem:[%s2361_s5 + $0x1cc] ss:$16 sps:$4 sm:$0xff]   ;;  %v1749_v2 = vld [vmem:[%s2361_s5 + $0x1e4] ss:$16 sps:$4 sm:$0xff]   ;;  %v1745_v3 = vld [vmem:[%s2361_s5 + $0x1c8] ss:$16 sps:$4 sm:$0xff]  }
  0x1d   : > { %873 = vmatpush1.bf16.msra.mxu1 %v1694_v27  ;;  %v1754_v4 = vld [vmem:[%s2361_s5 + $0x1e0] ss:$16 sps:$4 sm:$0xff]   ;;  %v1753_v5 = vld [vmem:[%s2361_s5 + $0x1ec] ss:$16 sps:$4 sm:$0xff]   ;;  %v1760_v6 = vld [vmem:[%s2360_s4 + $0x4] ss:$16 sps:$4 sm:$0xff]  }
  0x1e   : > { %912 = vmatpush1.bf16.msra.mxu0 %v1679_v22  ;;  %874 = vmatprep.subr.bf16.mxu1 %v1695_v29  ;;  %v1755_v7 = vld [vmem:[%s2081_s23] ss:$8 sps:$4 sm:$0xff]   ;;  %v1763_v10 = vld [vmem:[%s2360_s4 + $0xc] ss:$16 sps:$4 sm:$0xff]   ;;  %v1766_v11 = vld [vmem:[%s2360_s4 + $0x24] ss:$16 sps:$4 sm:$0xff]  }
  0x1f   : > { %913 = vmatprep.subr.bf16.mxu0 %v1687_v23  ;;  %v1751_v8 = vld [vmem:[%s2361_s5 + $0x1e8] ss:$16 sps:$4 sm:$0xff]   ;;  %v1758_v9 = vld [vmem:[%s2360_s4] ss:$16 sps:$4 sm:$0xff]   ;;  %v1769_v14 = vld [vmem:[%s2360_s4 + $0x2c] ss:$16 sps:$4 sm:$0xff]  }
  0x20   : > { %v1761_v12 = vld [vmem:[%s2360_s4 + $0x8] ss:$16 sps:$4 sm:$0xff]   ;;  %v1764_v13 = vld [vmem:[%s2360_s4 + $0x20] ss:$16 sps:$4 sm:$0xff]   ;;  %v1772_v15 = vld [vmem:[%s2360_s4 + $0x44] ss:$16 sps:$4 sm:$0xff]  }
  0x21   : > { %875 = vmatpush1.bf16.msra.mxu1 %v1700_v32  ;;  %v1767_v16 = vld [vmem:[%s2360_s4 + $0x28] ss:$16 sps:$4 sm:$0xff]   ;;  %v1770_v17 = vld [vmem:[%s2360_s4 + $0x40] ss:$16 sps:$4 sm:$0xff]   ;;  %v1775_v18 = vld [vmem:[%s2360_s4 + $0x4c] ss:$16 sps:$4 sm:$0xff]  }
  0x22   : > { %914 = vmatpush1.bf16.msra.mxu0 %v1685_v26  ;;  %876 = vmatprep.subr.bf16.mxu1 %v1701_v33  ;;  %v1778_v19 = vld [vmem:[%s2360_s4 + $0x64] ss:$16 sps:$4 sm:$0xff]   ;;  %v1773_v20 = vld [vmem:[%s2360_s4 + $0x48] ss:$16 sps:$4 sm:$0xff]   ;;  %v1776_v21 = vld [vmem:[%s2360_s4 + $0x60] ss:$16 sps:$4 sm:$0xff]  }
  0x23   : > { %915 = vmatprep.subr.bf16.mxu0 %v1693_v28  ;;  %v1781_v22 = vld [vmem:[%s2360_s4 + $0x6c] ss:$16 sps:$4 sm:$0xff]   ;;  %v1784_v23 = vld [vmem:[%s2360_s4 + $0x84] ss:$16 sps:$4 sm:$0xff]   ;;  %v1779_v24 = vld [vmem:[%s2360_s4 + $0x68] ss:$16 sps:$4 sm:$0xff]  }
  0x24   : > { %v1782_v25 = vld [vmem:[%s2360_s4 + $0x80] ss:$16 sps:$4 sm:$0xff]   ;;  %v1787_v26 = vld [vmem:[%s2360_s4 + $0x8c] ss:$16 sps:$4 sm:$0xff]   ;;  %v1790_v27 = vld [vmem:[%s2360_s4 + $0xa4] ss:$16 sps:$4 sm:$0xff]  }
  0x25   : > { %877 = vmatpush1.bf16.msra.mxu1 %v1706_v35  ;;  %v1785_v28 = vld [vmem:[%s2360_s4 + $0x88] ss:$16 sps:$4 sm:$0xff]   ;;  %v1788_v29 = vld [vmem:[%s2360_s4 + $0xa0] ss:$16 sps:$4 sm:$0xff]   ;;  %v1802_v35 = vld [vmem:[%s2360_s4 + $0xe4] ss:$16 sps:$4 sm:$0xff]  }
  0x26   : > { %916 = vmatpush1.bf16.msra.mxu0 %v1691_v30  ;;  %878 = vmatprep.subr.bf16.mxu1 %v1707_v37  ;;  %v1793_v30 = vld [vmem:[%s2360_s4 + $0xac] ss:$16 sps:$4 sm:$0xff]   ;;  %v1791_v32 = vld [vmem:[%s2360_s4 + $0xa8] ss:$16 sps:$4 sm:$0xff]   ;;  %v1794_v33 = vld [vmem:[%s2360_s4 + $0xc0] ss:$16 sps:$4 sm:$0xff]  }
  0x27   : > { %917 = vmatprep.subr.bf16.mxu0 %v1699_v31  ;;  %v1796_v31 = vld [vmem:[%s2360_s4 + $0xc4] ss:$16 sps:$4 sm:$0xff]   ;;  %v1800_v37 = vld [vmem:[%s2360_s4 + $0xe0] ss:$16 sps:$4 sm:$0xff]   ;;  %v1821_v52 = vld [vmem:[%s2360_s4 + $0x148] ss:$16 sps:$4 sm:$0xff]  }
  0x29   : > { %879 = vmatpush1.bf16.msra.mxu1 %v1712_v40  ;;  %v1803_v40 = vld [vmem:[%s2360_s4 + $0xe8] ss:$16 sps:$4 sm:$0xff]  }
  0x2a   : > { %918 = vmatpush1.bf16.msra.mxu0 %v1697_v34  ;;  %880 = vmatprep.subr.bf16.mxu1 %v1713_v41  ;;  %v1799_v34 = vld [vmem:[%s2360_s4 + $0xcc] ss:$16 sps:$4 sm:$0xff]   ;;  %v1806_v41 = vld [vmem:[%s2360_s4 + $0x100] ss:$16 sps:$4 sm:$0xff]  }
  0x2b   : > { %919 = vmatprep.subr.bf16.mxu0 %v1705_v36  ;;  %v1797_v36 = vld [vmem:[%s2360_s4 + $0xc8] ss:$16 sps:$4 sm:$0xff]  }
  0x2d   : > { %881 = vmatpush1.bf16.msra.mxu1 %v1718_v43  ;;  %v1814_v43 = vld [vmem:[%s2360_s4 + $0x124] ss:$16 sps:$4 sm:$0xff]  }
  0x2e   : > { %920 = vmatpush1.bf16.msra.mxu0 %v1703_v38  ;;  %882 = vmatprep.subr.bf16.mxu1 %v1719_v45  ;;  %v1805_v38 = vld [vmem:[%s2360_s4 + $0xec] ss:$16 sps:$4 sm:$0xff]   ;;  %v1812_v45 = vld [vmem:[%s2360_s4 + $0x120] ss:$16 sps:$4 sm:$0xff]  }
  0x2f   : > { %921 = vmatprep.subr.bf16.mxu0 %v1711_v39  ;;  %v1808_v39 = vld [vmem:[%s2360_s4 + $0x104] ss:$16 sps:$4 sm:$0xff]  }
  0x31   : > { %883 = vmatpush1.bf16.msra.mxu1 %v1724_v48  ;;  %v1815_v48 = vld [vmem:[%s2360_s4 + $0x128] ss:$16 sps:$4 sm:$0xff]  }
  0x32   : > { %922 = vmatpush1.bf16.msra.mxu0 %v1709_v42  ;;  %884 = vmatprep.subr.bf16.mxu1 %v1725_v49  ;;  %v1811_v42 = vld [vmem:[%s2360_s4 + $0x10c] ss:$16 sps:$4 sm:$0xff]   ;;  %v1818_v49 = vld [vmem:[%s2360_s4 + $0x140] ss:$16 sps:$4 sm:$0xff]  }
  0x33   : > { %923 = vmatprep.subr.bf16.mxu0 %v1717_v44  ;;  %v1809_v44 = vld [vmem:[%s2360_s4 + $0x108] ss:$16 sps:$4 sm:$0xff]  }
  0x35   : > { %885 = vmatpush1.bf16.msra.mxu1 %v1730_v51  ;;  %v1826_v51 = vld [vmem:[%s2360_s4 + $0x164] ss:$16 sps:$4 sm:$0xff]  }
  0x36   : > { %924 = vmatpush1.bf16.msra.mxu0 %v1715_v46  ;;  %886 = vmatprep.subr.bf16.mxu1 %v1731_v54  ;;  %v1817_v46 = vld [vmem:[%s2360_s4 + $0x12c] ss:$16 sps:$4 sm:$0xff]  }
  0x37   : > { %925 = vmatprep.subr.bf16.mxu0 %v1723_v47  ;;  %v1820_v47 = vld [vmem:[%s2360_s4 + $0x144] ss:$16 sps:$4 sm:$0xff]   ;;  %v1829_v54 = vld [vmem:[%s2360_s4 + $0x16c] ss:$16 sps:$4 sm:$0xff]  }
  0x39   : > { %887 = vmatpush1.bf16.msra.mxu1 %v1736_v56  ;;  %v1827_v56 = vld [vmem:[%s2360_s4 + $0x168] ss:$16 sps:$4 sm:$0xff]  }
  0x3a   : > { %926 = vmatpush1.bf16.msra.mxu0 %v1721_v50  ;;  %888 = vmatprep.subr.bf16.mxu1 %v1737_v58  ;;  %v1823_v50 = vld [vmem:[%s2360_s4 + $0x14c] ss:$16 sps:$4 sm:$0xff]  }
  0x3b   : > { %927 = vmatprep.subr.bf16.mxu0 %v1729_v53  ;;  %v1824_v53 = vld [vmem:[%s2360_s4 + $0x160] ss:$16 sps:$4 sm:$0xff]   ;;  %v1835_v58 = vld [vmem:[%s2360_s4 + $0x18c] ss:$16 sps:$4 sm:$0xff]  }
  0x3d   : > { %889 = vmatpush1.bf16.msra.mxu1 %v1742_v60  ;;  %v1833_v60 = vld [vmem:[%s2360_s4 + $0x188] ss:$16 sps:$4 sm:$0xff]  }
  0x3e   : > { %928 = vmatpush1.bf16.msra.mxu0 %v1727_v55  ;;  %890 = vmatprep.subr.bf16.mxu1 %v1743_v62  ;;  %v1832_v55 = vld [vmem:[%s2360_s4 + $0x184] ss:$16 sps:$4 sm:$0xff]   ;;  %v1841_v62 = vld [vmem:[%s2360_s4 + $0x1ac] ss:$16 sps:$4 sm:$0xff]  }
  0x3f   : > { %929 = vmatprep.subr.bf16.mxu0 %v1735_v57  ;;  %v1830_v57 = vld [vmem:[%s2360_s4 + $0x180] ss:$16 sps:$4 sm:$0xff]  }
  0x41   : > { %891 = vmatpush1.bf16.msra.mxu1 %v1748_v0  ;;  %v1839_v0 = vld [vmem:[%s2360_s4 + $0x1a8] ss:$16 sps:$4 sm:$0xff]  }
  0x42   : > { %930 = vmatpush1.bf16.msra.mxu0 %v1733_v59  ;;  %892 = vmatprep.subr.bf16.mxu1 %v1749_v2  ;;  %v1838_v59 = vld [vmem:[%s2360_s4 + $0x1a4] ss:$16 sps:$4 sm:$0xff]   ;;  %v1847_v2 = vld [vmem:[%s2360_s4 + $0x1cc] ss:$16 sps:$4 sm:$0xff]  }
  0x43   : > { %931 = vmatprep.subr.bf16.mxu0 %v1741_v61  ;;  %v1836_v61 = vld [vmem:[%s2360_s4 + $0x1a0] ss:$16 sps:$4 sm:$0xff]  }
  0x45   : > { %893 = vmatpush1.bf16.msra.mxu1 %v1754_v4  ;;  %v1845_v4 = vld [vmem:[%s2360_s4 + $0x1c8] ss:$16 sps:$4 sm:$0xff]  }
  0x46   : > { %932 = vmatpush1.bf16.msra.mxu0 %v1739_v63  ;;  %1268 = vmatprep.subr.bf16.mxu1 %v1760_v6  ;;  %v1844_v63 = vld [vmem:[%s2360_s4 + $0x1c4] ss:$16 sps:$4 sm:$0xff]   ;;  %v1853_v6 = vld [vmem:[%s2360_s4 + $0x1ec] ss:$16 sps:$4 sm:$0xff]  }
  0x47   : > { %933 = vmatprep.subr.bf16.mxu0 %v1747_v1  ;;  %v1842_v1 = vld [vmem:[%s2360_s4 + $0x1c0] ss:$16 sps:$4 sm:$0xff]  }
  0x48   : > { %895 = vmatmul.mubr.bf16.vlgmr.msra.gmra.mrb[0].mxu1 %v1755_v7 }
  0x49   : > { %1269 = vmatpush1.bf16.msra.mxu1 %v1758_v9 }
  0x4a   : > { %934 = vmatpush1.bf16.msra.mxu0 %v1745_v3  ;;  %1270 = vmatprep.subr.bf16.mxu1 %v1766_v11  ;;  %v1850_v3 = vld [vmem:[%s2360_s4 + $0x1e4] ss:$16 sps:$4 sm:$0xff]   ;;  %v318_v11 = vld [vmem:[%s2359_s3] sm:$0x3] }
  0x4b   : > { %935 = vmatprep.subr.bf16.mxu0 %v1753_v5  ;;  %v1848_v5 = vld [vmem:[%s2360_s4 + $0x1e0] ss:$16 sps:$4 sm:$0xff]  }
  0x4d   : > { %1271 = vmatpush1.bf16.msra.mxu1 %v1764_v13 }
  0x4e   : > { %936 = vmatpush1.bf16.msra.mxu0 %v1751_v8  ;;  %1272 = vmatprep.subr.bf16.mxu1 %v1772_v15  ;;  %v320_v8 = vlaneseq }
  0x4f   : > { %1311 = vmatprep.subr.bf16.mxu0 %v1763_v10 }
  0x50   : > { %v2337_v9 = vshrl.u32 %v320_v8, 7 }
  0x51   : > { %938 = vmatmul.mubr.bf16.vlgmr.msra.gmra.mrb[4].mxu0 %v1755_v7  ;;  %1273 = vmatpush1.bf16.msra.mxu1 %v1770_v17  ;;  %v1851_v7 = vld [vmem:[%s2360_s4 + $0x1e8] ss:$16 sps:$4 sm:$0xff]  }
  0x52   : > { %1312 = vmatpush1.bf16.msra.mxu0 %v1761_v12  ;;  %1274 = vmatprep.subr.bf16.mxu1 %v1778_v19  ;;  %v322_v10 = vsub.s32 0, %v2337_v9  ;;  %v326_v12 = vsub.s32 1, %v2337_v9 }
  0x53   : > { %1313 = vmatprep.subr.bf16.mxu0 %v1769_v14 }
  0x54   : > { %v323_v13 = vrot.slane %v318_v11, %v322_v10  ;;  %v327_v15 = vrot.slane %v318_v11, %v326_v12 }
  0x55   : > { %1275 = vmatpush1.bf16.msra.mxu1 %v1776_v21 }
  0x56   : > { %1314 = vmatpush1.bf16.msra.mxu0 %v1767_v16  ;;  %1276 = vmatprep.subr.bf16.mxu1 %v1784_v23 }
  0x57   : > { %1315 = vmatprep.subr.bf16.mxu0 %v1775_v18 }
  0x59   : > { %1277 = vmatpush1.bf16.msra.mxu1 %v1782_v25  ;;  %v1366_v25 = vsub.s32 2, %v2337_v9 }
  0x5a   : > { %1316 = vmatpush1.bf16.msra.mxu0 %v1773_v20  ;;  %1278 = vmatprep.subr.bf16.mxu1 %v1790_v27  ;;  %v1370_v27 = vsub.s32 3, %v2337_v9 }
  0x5b   : > { %1317 = vmatprep.subr.bf16.mxu0 %v1781_v22 }
  0x5d   : > { %1279 = vmatpush1.bf16.msra.mxu1 %v1788_v29 }
  0x5e   : > { %1318 = vmatpush1.bf16.msra.mxu0 %v1779_v24  ;;  %1280 = vmatprep.subr.bf16.mxu1 %v1796_v31 }
  0x5f   : > { %1319 = vmatprep.subr.bf16.mxu0 %v1787_v26  ;;  %v1354_v26 = vld [vmem:[%s2362_s6] sm:$0xf] }
  0x60   : > { %v1371_v29 = vrot.slane %v1354_v26, %v1370_v27 }
  0x61   : > { %1281 = vmatpush1.bf16.msra.mxu1 %v1794_v33 }
  0x62   : > { %1320 = vmatpush1.bf16.msra.mxu0 %v1785_v28  ;;  %1282 = vmatprep.subr.bf16.mxu1 %v1802_v35  ;;  %v1367_v28 = vrot.slane %v1354_v26, %v1366_v25 }
  0x63   : > { %1321 = vmatprep.subr.bf16.mxu0 %v1793_v30 }
  0x65   : > { %1283 = vmatpush1.bf16.msra.mxu1 %v1800_v37 }
  0x66   : > { %1322 = vmatpush1.bf16.msra.mxu0 %v1791_v32  ;;  %1284 = vmatprep.subr.bf16.mxu1 %v1808_v39 }
  0x67   : > { %1323 = vmatprep.subr.bf16.mxu0 %v1799_v34 }
  0x69   : > { %1285 = vmatpush1.bf16.msra.mxu1 %v1806_v41 }
  0x6a   : > { %1324 = vmatpush1.bf16.msra.mxu0 %v1797_v36  ;;  %1286 = vmatprep.subr.bf16.mxu1 %v1814_v43 }
  0x6b   : > { %1325 = vmatprep.subr.bf16.mxu0 %v1805_v38 }
  0x6d   : > { %1287 = vmatpush1.bf16.msra.mxu1 %v1812_v45 }
  0x6e   : > { %1326 = vmatpush1.bf16.msra.mxu0 %v1803_v40  ;;  %1288 = vmatprep.subr.bf16.mxu1 %v1820_v47 }
  0x6f   : > { %1327 = vmatprep.subr.bf16.mxu0 %v1811_v42 }
  0x71   : > { %1289 = vmatpush1.bf16.msra.mxu1 %v1818_v49 }
  0x72   : > { %1328 = vmatpush1.bf16.msra.mxu0 %v1809_v44  ;;  %1290 = vmatprep.subr.bf16.mxu1 %v1826_v51 }
  0x73   : > { %1329 = vmatprep.subr.bf16.mxu0 %v1817_v46 }
  0x75   : > { %1291 = vmatpush1.bf16.msra.mxu1 %v1824_v53 }
  0x76   : > { %1330 = vmatpush1.bf16.msra.mxu0 %v1815_v48  ;;  %1292 = vmatprep.subr.bf16.mxu1 %v1832_v55 }
  0x77   : > { %1331 = vmatprep.subr.bf16.mxu0 %v1823_v50 }
  0x79   : > { %1293 = vmatpush1.bf16.msra.mxu1 %v1830_v57 }
  0x7a   : > { %1332 = vmatpush1.bf16.msra.mxu0 %v1821_v52  ;;  %1294 = vmatprep.subr.bf16.mxu1 %v1838_v59  ;;  %v1363_v59 = vrot.slane %v1354_v26, %v326_v12 }
  0x7b   : > { %1333 = vmatprep.subr.bf16.mxu0 %v1829_v54 }
  0x7d   : > { %1295 = vmatpush1.bf16.msra.mxu1 %v1836_v61 }
  0x7e   : > { %1334 = vmatpush1.bf16.msra.mxu0 %v1827_v56  ;;  %1296 = vmatprep.subr.bf16.mxu1 %v1844_v63 }
  0x7f   : > { %1335 = vmatprep.subr.bf16.mxu0 %v1835_v58  ;;  %v1359_v58 = vrot.slane %v1354_v26, %v322_v10 }
  0x81   : > { %1297 = vmatpush1.bf16.msra.mxu1 %v1842_v1 }
  0x82   : > { %1336 = vmatpush1.bf16.msra.mxu0 %v1833_v60  ;;  %1298 = vmatprep.subr.bf16.mxu1 %v1850_v3 }
  0x83   : > { %1337 = vmatprep.subr.bf16.mxu0 %v1841_v62 }
  0x85   : > { %1299 = vmatpush1.bf16.msra.mxu1 %v1848_v5 }
  0x86   : > { %1338 = vmatpush1.bf16.msra.mxu0 %v1839_v0 }
  0x87   : > { %1339 = vmatprep.subr.bf16.mxu0 %v1847_v2 }
  0x8a   : > { %1340 = vmatpush1.bf16.msra.mxu0 %v1845_v4 }
  0x8b   : > { %1341 = vmatprep.subr.bf16.mxu0 %v1853_v6 }
  0x8e   : > { %1342 = vmatpush1.bf16.msra.mxu0 %v1851_v7 }
  0xe4   : > { %v393_v14 = vpop.f32.mrb[0].mxu0 }
  0xe5   : > { %v395_v16 = vpop.f32.mrb[1].mxu0  ;;  %v394_v18 = vadd.f32 %v393_v14, %v323_v13 }
  0xe6   : > { %v397_v17 = vpop.f32.mrb[2].mxu0  ;;  %v396_v21 = vadd.f32 %v395_v16, %v327_v15 }
  0xe7   : > { %v398_v19 = vadd.f32 %v397_v17, %v323_v13  ;;  %v399_v20 = vpop.f32.mrb[3].mxu0 }
  0xe8   : > { %v400_v22 = vadd.f32 %v399_v20, %v327_v15 }
  0xe9   : > { %v402_v23 = vpack.c.bf16 %v398_v19, %v394_v18 }
  0xea   : > { %v403_v24 = vpack.c.bf16 %v400_v22, %v396_v21 }
  0xec   : > { %1300 = vmatprep.mubr.bf16.mxu1 %v403_v24  ;;  %1343 = vmatprep.mubr.bf16.mxu0 %v403_v24 }
  0xed   : > { %1301 = vmatmul.mubr.bf16.vlgmr.msra.gmra.mrb[0].mxu1 %v402_v23  ;;  %1344 = vmatmul.mubr.bf16.vlgmr.msra.gmra.mrb[4].mxu0 %v402_v23 }
 0x1c0   : > { %v1302_v30 = vpop.f32.mrb[0].mxu1  ;;  %v1345_v31 = vpop.f32.mrb[4].mxu0 }
 0x1c1   : > { %v1378_v32 = vadd.f32 %v1367_v28, %v1345_v31  ;;  %v1304_v33 = vpop.f32.mrb[1].mxu1  ;;  %v1347_v34 = vpop.f32.mrb[5].mxu0  ;;  %v1376_v60 = vadd.f32 %v1359_v58, %v1302_v30 }
 0x1c2   : > { %v1379_v35 = vadd.f32 %v1371_v29, %v1347_v34  ;;  %v1306_v36 = vpop.f32.mrb[2].mxu1  ;;  %v1349_v37 = vpop.f32.mrb[6].mxu0  ;;  %v1377_v62 = vadd.f32 %v1363_v59, %v1304_v33 }
 0x1c3   : > { %v1384_v38 = vsub.f32 0.0, %v1378_v32  ;;  %v1382_v39 = vadd.f32 %v1367_v28, %v1349_v37  ;;  %v1308_v40 = vpop.f32.mrb[3].mxu1  ;;  %v1351_v41 = vpop.f32.mrb[7].mxu0  ;;  %v1380_v1 = vadd.f32 %v1359_v58, %v1306_v36 }
 0x1c4   : > { %v1385_v42 = vsub.f32 0.0, %v1379_v35  ;;  %v1383_v43 = vadd.f32 %v1371_v29, %v1351_v41  ;;  %v1381_v4 = vadd.f32 %v1363_v59, %v1308_v40 }
 0x1c5   : > { %v1388_v44 = vmul.f32 1.442695, %v1384_v38  ;;  %v1386_v45 = vsub.f32 0.0, %v1382_v39 }
 0x1c6   : > { %v1390_v46 = vmul.f32 1.442695, %v1385_v42  ;;  %v1387_v47 = vsub.f32 0.0, %v1383_v43 }
 0x1c7   : > { %1854 = vpow2.f32 %v1388_v44  ;;  %v1392_v48 = vmul.f32 1.442695, %v1386_v45 }
 0x1c8   : > { %1856 = vpow2.f32 %v1390_v46  ;;  %v1394_v49 = vmul.f32 1.442695, %v1387_v47 }
 0x1c9   : > { %1858 = vpow2.f32 %v1392_v48 }
 0x1ca   : > { %1860 = vpow2.f32 %v1394_v49 }
 0x1d1   : > { %v1855_v50 = vpop.eup %1854 }
 0x1d2   : > { %v1857_v51 = vpop.eup %1856  ;;  %v1396_v52 = vadd.f32 1.0, %v1855_v50 }
 0x1d3   : > { %v1859_v53 = vpop.eup %1858  ;;  %v1397_v54 = vadd.f32 1.0, %v1857_v51 }
 0x1d4   : > { %v1861_v55 = vpop.eup %1860  ;;  %1862 = vrcp.f32 %v1396_v52  ;;  %v1398_v56 = vadd.f32 1.0, %v1859_v53 }
 0x1d5   : > { %1864 = vrcp.f32 %v1397_v54  ;;  %v1399_v57 = vadd.f32 1.0, %v1861_v55 }
 0x1d6   : > { %1866 = vrcp.f32 %v1398_v56 }
 0x1d7   : > { %1868 = vrcp.f32 %v1399_v57 }
 0x1de   : > { %v1863_v61 = vpop.eup %1862 }
 0x1df   : > { %v1865_v63 = vpop.eup %1864  ;;  %v1404_v0 = vmul.f32 %v1863_v61, %v1376_v60 }
 0x1e0   : > { %v1867_v2 = vpop.eup %1866  ;;  %v1405_v3 = vmul.f32 %v1865_v63, %v1377_v62 }
 0x1e1   : > { %v1869_v5 = vpop.eup %1868  ;;  %1408 = vst [vmem:[%s307_s11] sm:$0xff] %v1404_v0  ;;  %v1406_v6 = vmul.f32 %v1867_v2, %v1380_v1 }
 0x1e2   : > { %1409 = vst [vmem:[%s307_s11 + $0x8] sm:$0xff] %v1405_v3  ;;  %v1407_v7 = vmul.f32 %v1869_v5, %v1381_v4 }
 0x1e3   : > { %1410 = vst [vmem:[%s307_s11 + $0x10] sm:$0xff] %v1406_v6 }
 0x1e4   : > { %1411 = vst [vmem:[%s307_s11 + $0x18] sm:$0xff] %v1407_v7 }
 0x1e5 PF: > { %s17_s24 = sadd.s32 1, %s1876_s24  }
 0x1e6   : > { %p14_p4 = scmp.ge.s32.totalorder %s17_s24, 6  }
 0x1e8   :  { %16 = sbr.rel (!%p14_p4) target bundleno = 1 (0x1), region = 81 }

</bundles_post_ra>
